<compile_context>
chip_gen: v7x
topology: tpu7x:2x2x1
jax: 0.10.0
libtpu: 0.0.40
codegen_flags: <defaults>
</compile_context>

<pallas_src>
import functools

import jax
import jax.numpy as jnp
import numpy as np
from jax import lax
from jax.experimental import pallas as pl
from jax.experimental.pallas import tpu as pltpu

C_IN = 256            # hard-coded in the PyTorch module for mode='direction'
C_OUT = 3             # conv out channels
C_OUT_PAD = 8         # pad tiny out-channel dim to one sublane group (zeros are inert)
MAX_TILE_BYTES = 2 << 20   # per-operand input bytes per grid step (double-buffered by Pallas)
EPS = 1e-8            # torch.nn.CosineSimilarity default eps


def _cosine_loss_kernel(x1_ref, x2_ref, wt_ref, b_ref, out_ref, *, hw, tile_hw):
    """Per tile: 1x1 conv (channel matmul + bias), per-pixel cosine, partial sum."""
    j = pl.program_id(1)

    w = wt_ref[...]            # (C_OUT_PAD, C_IN); padded rows are zero
    b = b_ref[...]             # (C_OUT_PAD, 1);   padded rows are zero

    # 1x1 conv == channel matmul on the MXU; lanes = pixels, f32 accumulation.
    z1 = jnp.dot(w, x1_ref[...], preferred_element_type=jnp.float32) + b  # (8, tile_hw)
    z2 = jnp.dot(w, x2_ref[...], preferred_element_type=jnp.float32) + b

    # Cosine similarity over the (sublane) channel axis; padded channels are zero.
    dots = jnp.sum(z1 * z2, axis=0, keepdims=True)   # (1, tile_hw)
    ss1 = jnp.sum(z1 * z1, axis=0, keepdims=True)
    ss2 = jnp.sum(z2 * z2, axis=0, keepdims=True)
    # torch: dot / max(||z1||*||z2||, eps)  ==  dot * rsqrt(max(ss1*ss2, eps^2))
    cos = dots * lax.rsqrt(jnp.maximum(ss1 * ss2, EPS * EPS))

    last_j = pl.num_programs(1) - 1

    @pl.when(j != last_j)
    def _():
        out_ref[...] = jnp.sum(cos, axis=-1, keepdims=True)

    @pl.when(j == last_j)  # only the (possibly ragged) edge tile pays for the mask
    def _():
        col = j * tile_hw + lax.broadcasted_iota(jnp.int32, (1, tile_hw), 1)
        out_ref[...] = jnp.sum(jnp.where(col < hw, cos, 0.0), axis=-1, keepdims=True)


def _pick_tile_hw(hw, itemsize):
    """Largest lane tile (multiple of 128) whose per-operand block is <= MAX_TILE_BYTES."""
    max_tile = max(128, ((MAX_TILE_BYTES // (C_IN * itemsize)) // 128) * 128)
    if hw <= max_tile:
        return hw          # single block == full dim (always a legal block shape)
    return max_tile        # multiple of 128; ragged edge block is masked in-kernel


def contrastive_loss_direction(f1, f2, conv_w, conv_b):
    """f1, f2: (B, 256, H, W) float32 or bfloat16 (NCHW).
    conv_w: (3, 256, 1, 1), conv_b: (3,) -- PyTorch Conv2d parameter shapes."""
    B, C, H, W = f1.shape
    assert C == C_IN and f2.shape == f1.shape
    HW = H * W
    N = B * HW

    # Free reshape (contiguous): no NCHW->NHWC transpose, no pad -> no extra HBM traffic.
    x1 = f1.reshape(B, C_IN, HW)
    x2 = f2.reshape(B, C_IN, HW)

    in_dtype = x1.dtype
    tile_hw = _pick_tile_hw(HW, jnp.dtype(in_dtype).itemsize)
    grid_hw = pl.cdiv(HW, tile_hw)

    # Conv weight (3,256,1,1) -> (3,256), sublane-padded to (8,256); zero-padded
    # rows (and zero-padded bias) contribute nothing to dots or norms.
    w_t = jnp.zeros((C_OUT_PAD, C_IN), in_dtype).at[:C_OUT, :].set(
        conv_w.reshape(C_OUT, C_IN).astype(in_dtype))
    b_col = jnp.zeros((C_OUT_PAD, 1), jnp.float32).at[:C_OUT, 0].set(
        conv_b.astype(jnp.float32))

    kernel = functools.partial(_cosine_loss_kernel, hw=HW, tile_hw=tile_hw)

    partials = pl.pallas_call(
        kernel,
        out_shape=jax.ShapeDtypeStruct((B, grid_hw, 1, 1), jnp.float32),
        grid_spec=pltpu.PrefetchScalarGridSpec(
            num_scalar_prefetch=0,
            grid=(B, grid_hw),
            in_specs=[
                pl.BlockSpec((None, C_IN, tile_hw), lambda b, j: (b, 0, j)),
                pl.BlockSpec((None, C_IN, tile_hw), lambda b, j: (b, 0, j)),
                pl.BlockSpec((C_OUT_PAD, C_IN), lambda b, j: (0, 0)),
                pl.BlockSpec((C_OUT_PAD, 1), lambda b, j: (0, 0)),
            ],
            out_specs=pl.BlockSpec((None, None, 1, 1), lambda b, j: (b, j, 0, 0)),
        ),
        compiler_params=pltpu.CompilerParams(
            dimension_semantics=("parallel", "parallel")),
    )(x1, x2, w_t, b_col)

    # Single final normalization (defers the divide; tighter rounding than per-tile).
    return jnp.sum(partials) / np.float32(N)


def _reference_loss(f1, f2, conv_w, conv_b):
    """Pure-JAX reference of the PyTorch forward (direction mode)."""
    w = conv_w.reshape(C_OUT, C_IN)
    f1 = f1.astype(jnp.float32)
    f2 = f2.astype(jnp.float32)
    z1 = jnp.einsum('bchw,oc->bohw', f1, w) + conv_b[None, :, None, None]
    z2 = jnp.einsum('bchw,oc->bohw', f2, w) + conv_b[None, :, None, None]
    dots = jnp.sum(z1 * z2, axis=1)
    n1 = jnp.sqrt(jnp.sum(z1 * z1, axis=1))
    n2 = jnp.sqrt(jnp.sum(z2 * z2, axis=1))
    cos = dots / jnp.maximum(n1 * n2, EPS)   # torch clamps the *product* of norms
    return jnp.mean(cos)


if __name__ == "__main__":
    key = jax.random.PRNGKey(0)
    k1, k2, kw, kb = jax.random.split(key, 4)

    B, H, W = 2, 16, 16
    f1 = jax.random.normal(k1, (B, C_IN, H, W), jnp.float32)
    f2 = jax.random.normal(k2, (B, C_IN, H, W), jnp.float32)

    # Deterministic synthetic Conv2d(256, 3, 1) parameters (PyTorch shapes / init range).
    fan_in = C_IN * 1 * 1
    bound = 1.0 / np.sqrt(fan_in)
    conv_w = jax.random.uniform(kw, (C_OUT, C_IN, 1, 1), jnp.float32, -bound, bound)
    conv_b = jax.random.uniform(kb, (C_OUT,), jnp.float32, -bound, bound)

    loss = jax.block_until_ready(contrastive_loss_direction(f1, f2, conv_w, conv_b))
    ref = jax.block_until_ready(_reference_loss(f1, f2, conv_w, conv_b))

    assert np.allclose(np.asarray(loss), np.asarray(ref), rtol=1e-5, atol=1e-5), (loss, ref)
    print("KERNEL_OK")
</pallas_src>

<mosaic_0001>
module attributes {stable_mosaic.version = 11 : i64} {
  func.func @_cosine_loss_kernel(%arg0: i32, %arg1: i32, %arg2: memref<1x256x256xf32, #tpu.memory_space<vmem>>, %arg3: memref<1x256x256xf32, #tpu.memory_space<vmem>>, %arg4: memref<8x256xf32, #tpu.memory_space<vmem>>, %arg5: memref<8x1xf32, #tpu.memory_space<vmem>>, %arg6: memref<1x1x1x1xf32, #tpu.memory_space<vmem>>) attributes {dimension_semantics = [#tpu.dimension_semantics<parallel>, #tpu.dimension_semantics<parallel>], iteration_bounds = array<i64: 2, 1>, scalar_prefetch = 0 : i64, scratch_operands = 0 : i64, tpu.core_type = #tpu.core_type<tc>, window_params = [{transform_indices = @transform_0, window_bounds = array<i64: 1, 256, 256>}, {transform_indices = @transform_1, window_bounds = array<i64: 1, 256, 256>}, {pipeline_mode = #tpu.pipeline_mode<synchronous>, transform_indices = @transform_2, window_bounds = array<i64: 8, 256>}, {pipeline_mode = #tpu.pipeline_mode<synchronous>, transform_indices = @transform_3, window_bounds = array<i64: 8, 1>}, {transform_indices = @transform_4, window_bounds = array<i64: 1, 1, 1, 1>}]} {
    %c0 = arith.constant 0 : index
    %c0_0 = arith.constant 0 : index
    %0 = vector.load %arg4[%c0, %c0_0] : memref<8x256xf32, #tpu.memory_space<vmem>>, vector<8x256xf32>
    %c0_1 = arith.constant 0 : index
    %c0_2 = arith.constant 0 : index
    %1 = vector.load %arg5[%c0_1, %c0_2] : memref<8x1xf32, #tpu.memory_space<vmem>>, vector<8x1xf32>
    %c0_3 = arith.constant 0 : index
    %c0_4 = arith.constant 0 : index
    %c0_5 = arith.constant 0 : index
    %2 = vector.load %arg2[%c0_3, %c0_4, %c0_5] : memref<1x256x256xf32, #tpu.memory_space<vmem>>, vector<1x256x256xf32>
    %3 = vector.shape_cast %2 : vector<1x256x256xf32> to vector<256x256xf32>
    %cst = arith.constant dense<0.000000e+00> : vector<8x256xf32>
    %4 = tpu.matmul %0, %3, %cst {dimension_numbers = #tpu.dot_dimension_numbers<[1], [0], [0], [1], [0, 0, 1, 1], [], []>} : vector<8x256xf32>, vector<256x256xf32>, vector<8x256xf32> -> vector<8x256xf32>
    %5 = vector.broadcast %1 : vector<8x1xf32> to vector<8x256xf32>
    %6 = arith.addf %4, %5 : vector<8x256xf32>
    %c0_6 = arith.constant 0 : index
    %c0_7 = arith.constant 0 : index
    %c0_8 = arith.constant 0 : index
    %7 = vector.load %arg3[%c0_6, %c0_7, %c0_8] : memref<1x256x256xf32, #tpu.memory_space<vmem>>, vector<1x256x256xf32>
    %8 = vector.shape_cast %7 : vector<1x256x256xf32> to vector<256x256xf32>
    %cst_9 = arith.constant dense<0.000000e+00> : vector<8x256xf32>
    %9 = tpu.matmul %0, %8, %cst_9 {dimension_numbers = #tpu.dot_dimension_numbers<[1], [0], [0], [1], [0, 0, 1, 1], [], []>} : vector<8x256xf32>, vector<256x256xf32>, vector<8x256xf32> -> vector<8x256xf32>
    %10 = vector.broadcast %1 : vector<8x1xf32> to vector<8x256xf32>
    %11 = arith.addf %9, %10 : vector<8x256xf32>
    %12 = arith.mulf %6, %11 : vector<8x256xf32>
    %cst_10 = arith.constant dense<0.000000e+00> : vector<256xf32>
    %13 = vector.multi_reduction <add>, %12, %cst_10 [0] : vector<8x256xf32> to vector<256xf32>
    %14 = vector.shape_cast %13 : vector<256xf32> to vector<1x256xf32>
    %15 = arith.mulf %6, %6 : vector<8x256xf32>
    %cst_11 = arith.constant dense<0.000000e+00> : vector<256xf32>
    %16 = vector.multi_reduction <add>, %15, %cst_11 [0] : vector<8x256xf32> to vector<256xf32>
    %17 = vector.shape_cast %16 : vector<256xf32> to vector<1x256xf32>
    %18 = arith.mulf %11, %11 : vector<8x256xf32>
    %cst_12 = arith.constant dense<0.000000e+00> : vector<256xf32>
    %19 = vector.multi_reduction <add>, %18, %cst_12 [0] : vector<8x256xf32> to vector<256xf32>
    %20 = vector.shape_cast %19 : vector<256xf32> to vector<1x256xf32>
    %21 = arith.mulf %17, %20 : vector<1x256xf32>
    %cst_13 = arith.constant 1.000000e-16 : f32
    %22 = vector.broadcast %cst_13 : f32 to vector<1x256xf32>
    %23 = arith.maximumf %21, %22 : vector<1x256xf32>
    %24 = math.rsqrt %23 : vector<1x256xf32>
    %25 = arith.mulf %14, %24 : vector<1x256xf32>
    %c0_i32 = arith.constant 0 : i32
    %26 = arith.cmpi ne, %arg1, %c0_i32 : i32
    %27 = arith.extui %26 : i1 to i32
    %c0_i32_14 = arith.constant 0 : i32
    %28 = arith.cmpi ne, %27, %c0_i32_14 : i32
    scf.if %28 {
      %cst_17 = arith.constant dense<0.000000e+00> : vector<1xf32>
      %32 = vector.multi_reduction <add>, %25, %cst_17 [1] : vector<1x256xf32> to vector<1xf32>
      %33 = vector.shape_cast %32 : vector<1xf32> to vector<1x1xf32>
      %c0_18 = arith.constant 0 : index
      %c0_19 = arith.constant 0 : index
      %c0_20 = arith.constant 0 : index
      %c0_21 = arith.constant 0 : index
      %34 = vector.load %arg6[%c0_18, %c0_19, %c0_20, %c0_21] : memref<1x1x1x1xf32, #tpu.memory_space<vmem>>, vector<1x1x1x1xf32>
      %35 = vector.shape_cast %34 : vector<1x1x1x1xf32> to vector<1x1xf32>
      %36 = vector.shape_cast %33 : vector<1x1xf32> to vector<1x1x1x1xf32>
      tpu.vector_store %arg6[%c0_18, %c0_19, %c0_20, %c0_21], %36 {strides = array<i32>} : memref<1x1x1x1xf32, #tpu.memory_space<vmem>>, vector<1x1x1x1xf32>,
    } else {
    }
    %c0_i32_15 = arith.constant 0 : i32
    %29 = arith.cmpi eq, %arg1, %c0_i32_15 : i32
    %30 = arith.extui %29 : i1 to i32
    %c0_i32_16 = arith.constant 0 : i32
    %31 = arith.cmpi ne, %30, %c0_i32_16 : i32
    scf.if %31 {
      %c256_i32 = arith.constant 256 : i32
      %32 = arith.muli %arg1, %c256_i32 : i32
      %33 = tpu.iota {dimensions = array<i32: 1>} : vector<1x256xi32>
      %34 = vector.broadcast %32 : i32 to vector<1x256xi32>
      %35 = arith.addi %34, %33 : vector<1x256xi32>
      %c256_i32_17 = arith.constant 256 : i32
      %36 = vector.broadcast %c256_i32_17 : i32 to vector<1x256xi32>
      %37 = arith.cmpi slt, %35, %36 : vector<1x256xi32>
      %cst_18 = arith.constant 0.000000e+00 : f32
      %38 = vector.broadcast %cst_18 : f32 to vector<1x256xf32>
      %39 = arith.select %37, %25, %38 : vector<1x256xi1>, vector<1x256xf32>
      %cst_19 = arith.constant dense<0.000000e+00> : vector<1xf32>
      %40 = vector.multi_reduction <add>, %39, %cst_19 [1] : vector<1x256xf32> to vector<1xf32>
      %41 = vector.shape_cast %40 : vector<1xf32> to vector<1x1xf32>
      %c0_20 = arith.constant 0 : index
      %c0_21 = arith.constant 0 : index
      %c0_22 = arith.constant 0 : index
      %c0_23 = arith.constant 0 : index
      %42 = vector.load %arg6[%c0_20, %c0_21, %c0_22, %c0_23] : memref<1x1x1x1xf32, #tpu.memory_space<vmem>>, vector<1x1x1x1xf32>
      %43 = vector.shape_cast %42 : vector<1x1x1x1xf32> to vector<1x1xf32>
      %44 = vector.shape_cast %41 : vector<1x1xf32> to vector<1x1x1x1xf32>
      tpu.vector_store %arg6[%c0_20, %c0_21, %c0_22, %c0_23], %44 {strides = array<i32>} : memref<1x1x1x1xf32, #tpu.memory_space<vmem>>, vector<1x1x1x1xf32>,
    } else {
    }
    return
  }
  func.func @transform_0(%arg0: i32, %arg1: i32) -> (i32, i32, i32) {
    %c0_i32 = arith.constant 0 : i32
    %c0_i32_0 = arith.constant 0 : i32
    return %arg0, %c0_i32, %arg1 : i32, i32, i32
  }
  func.func @transform_1(%arg0: i32, %arg1: i32) -> (i32, i32, i32) {
    %c0_i32 = arith.constant 0 : i32
    %c0_i32_0 = arith.constant 0 : i32
    return %arg0, %c0_i32, %arg1 : i32, i32, i32
  }
  func.func @transform_2(%arg0: i32, %arg1: i32) -> (i32, i32) {
    %c0_i32 = arith.constant 0 : i32
    %c0_i32_0 = arith.constant 0 : i32
    %c0_i32_1 = arith.constant 0 : i32
    return %c0_i32, %c0_i32_0 : i32, i32
  }
  func.func @transform_3(%arg0: i32, %arg1: i32) -> (i32, i32) {
    %c0_i32 = arith.constant 0 : i32
    %c0_i32_0 = arith.constant 0 : i32
    %c0_i32_1 = arith.constant 0 : i32
    return %c0_i32, %c0_i32_0 : i32, i32
  }
  func.func @transform_4(%arg0: i32, %arg1: i32) -> (i32, i32, i32, i32) {
    %c0_i32 = arith.constant 0 : i32
    %c0_i32_0 = arith.constant 0 : i32
    %c0_i32_1 = arith.constant 0 : i32
    return %arg0, %arg1, %c0_i32, %c0_i32_0 : i32, i32, i32, i32
  }
}

</mosaic_0001>

<bundles_post_ra>
// kernel: tpu_custom_call.1
= control target key start
LH: loop header
LB: loop body
LE: loop exit
PB: predicated region body
PF: predicated region fallthrough
CT: control target
= control target key end

     0   :  { %9 = vsyncpa [#allocation3], 0  ;;  %s1431_s0 = inlined_call_operand.hbm [shape: f32[2,256,256], index: 0, kind: input, shape index: {}]   ;;  %s1432_s1 = inlined_call_operand.hbm [shape: f32[2,256,256], index: 1, kind: input, shape index: {}]   ;;  %s1433_s2 = inlined_call_operand.vmem [shape: f32[8,256], index: 2, kind: input, shape index: {}]   ;;  %s1434_s3 = inlined_call_operand.vmem [shape: f32[8,1], index: 3, kind: input, shape index: {}]   ;;  %s1435_s4 = inlined_call_operand.vmem [shape: f32[2,1,1,1], index: 4, kind: output, shape index: {}]  }
   0x1   :  { %11 = vsyncpa [#allocation3 + $0x1], 0 }
   0x2   :  { %12 = vsyncpa [#allocation5], 0 }
   0x3   :  { %14 = vsyncpa [#allocation5 + $0x1], 0  ;;  %s1106_s15 = smov 0   ;;  %s1108_s16 = smov 0  }
   0x4   :  { %s1110_s17 = smov 0   ;;  %s1112_s18 = smov 0  }
   0x5   :  { %s1114_s19 = smov 0   ;;  %s1116_s20 = smov 0  }
   0x6 LB: > { %s747_s21 = sadd.s32 4294967295, %s1074_s20   ;;  %s32_s22 = sadd.s32 1, %s1070_s19  ;;  %s1074_s20 = sphi %s1116_s20, %s20_s20   ;;  %s1070_s19 = sphi %s1114_s19, %s1446_s19   ;;  %s1066_s18 = sphi %s1112_s18, %s1445_s18   ;;  %s1062_s17 = sphi %s1110_s17, %s1444_s17   ;;  %s1058_s16 = sphi %s1108_s16, %s1443_s16   ;;  %s1054_s15 = sphi %s1106_s15, %s1442_s15  }
   0x7   : > { %p34_p0 = scmp.ge.s32.totalorder %s32_s22, 2  ;;  %s41_s23 = sadd.s32 1, %s1062_s17 }
   0x8   : > { %p48_p1 = scmp.ne.s32.totalorder %s1062_s17, %s1058_s16  ;;  %p49_p2 = scmp.eq.s32.totalorder %s1074_s20, 0 }
   0x9   : > { %s1448_s22 = smov (%p34_p0, %s32_s22), 0  ;;  %p54_p4 = scmp.ne.s32.totalorder %s1058_s16, %s1054_s15 }
   0xa   : > { %p1142_p3 = por %p49_p2, %p48_p1  ;;  %s36_s25 = ssub.s32 %s1070_s19, %s1448_s22 }
   0xb   : > { %p55_p5 = scmp.eq.s32.totalorder %s747_s21, 0  ;;  %p39_p6 = scmp.eq.s32.totalorder %s36_s25, 0 }
   0xc   : > { %p903_p8 = scmp.lt.s32.totalorder %s1074_s20, 2  ;;  %s1158_s28 = sand.u32 1, %s1062_s17  }
   0xd   : > { %p1149_p7 = por %p55_p5, %p54_p4  ;;  %s762_s29 = sshll.u32 %s1070_s19, 13 }
   0xe   : > { %s1155_s27 = scalar_select %p39_p6, %s1062_s17, %s41_s23  }
   0xf   : > { %s1438_s26 = scalar_select %p1149_p7, 1, 0 }
  0x10   : > { %s751_s30 = sshll.u32 %s1158_s28, 9  ;;  %s1167_s7 = scalar_lea.hbm %s1431_s0, %s762_s29 }
  0x11   : > { %s186_s8 = scalar_lea.vmem [#allocation2], %s751_s30  ;;  %p1173_p9 = pnand %p903_p8, %p1142_p3 }
  0x12   : > { %s195_s9 = sshll.u32 %s186_s8, 4  ;;  %s183_s11 = scalar_lea.sflag [#allocation3], %s1158_s28  ;;  %s1177_s9 = int_to_ptr.vmem [resolvable:$true] %s195_s9 }
  0x13   : > { %s960_s12 = scalar_lea.hbm %s1167_s7, 8192  ;;  %p962_p11 = pneg %p1173_p9 }
  0x14   : > { %p961_p10 = scmp.ne.s32.totalorder %s1167_s7, %s960_s12  ;;  %s965_s15 = scalar_lea.hbm %s1431_s0, 16384 }
  0x15   : > { %p966_p0 = scmp.lt.u32.totalorder %s1167_s7, %s1431_s0  ;;  %p967_p1 = scmp.lt.u32.totalorder %s965_s15, %s960_s12 }
  0x16   : > { %p963_p12 = pnand %p962_p11, %p961_p10  ;;  %p969_p3 = scmp.lt.u32.totalorder %s960_s12, %s1167_s7 }
  0x17   : > { %p968_p2 = por %p967_p1, %p966_p0 }
  0x18   : > { %p964_p13 = pneg %p963_p12 }
  0x19   : > { %p970_p4 = por %p969_p3, %p968_p2 }
  0x1b   : > { %p971_p5 = pnand %p970_p4, %p964_p13 }
  0x1d   : > { %974 = shalt.err (!%p971_p5)
}
  0x1e   : > { %s975_s24 = scalar_lea.vmem %s1177_s9, 8192  ;;  %s1076_s25 = smov [#allocation2]  }
  0x1f   : > { %p976_p6 = scmp.ne.s32.totalorder %s1177_s9, %s975_s24  ;;  %s980_s5 = sshll.u32 %s1076_s25, 4  ;;  %s981_s5 = int_to_ptr.vmem [resolvable:$false] %s980_s5 }
  0x20   : > { %s982_s6 = scalar_lea.vmem %s981_s5, 16384  ;;  %p983_p12 = scmp.lt.s32.totalorder %s1177_s9, %s981_s5 }
  0x21   : > { %p978_p8 = pnand %p976_p6, %p962_p11  ;;  %p984_p0 = scmp.lt.s32.totalorder %s982_s6, %s975_s24 }
  0x23   : > { %p979_p10 = pneg %p978_p8  ;;  %p985_p1 = por %p984_p0, %p983_p12 }
  0x25   : > { %p986_p2 = pnand %p985_p1, %p979_p10 }
  0x27   : > { %989 = shalt.err (!%p986_p2)
}
  0x28   : > { %s1077_s8 = smov 256   ;;  %s1078_s12 = smov 16  }
  0x29   : > { %899 = dma.hbm_to_vmem [thread:$0]  (!%p1173_p9), %s1167_s7, 8192, %s1177_s9, %s183_s11, %s1077_s8, %s1077_s8, %s1078_s12  }
  0x2a   : > { %p757_p13 = scmp.ge.s32.totalorder %s1074_s20, 1  ;;  %p226_p3 = scmp.lt.s32.totalorder %s1074_s20, 3 }
  0x2b   : > { %s1221_s21 = scalar_lea.hbm %s1432_s1, %s762_s29  ;;  %s209_s23 = scalar_lea.vmem [#allocation4], %s751_s30 }
  0x2c   : > { %p1212_p4 = pnand %p757_p13, %p226_p3  ;;  %s218_s24 = sshll.u32 %s209_s23, 4  ;;  %s1225_s24 = int_to_ptr.vmem [resolvable:$true] %s218_s24 }
  0x2d   : > { %s206_s7 = scalar_lea.sflag [#allocation5], %s1158_s28  ;;  %s990_s9 = scalar_lea.hbm %s1221_s21, 8192 }
  0x2e   : > { %p991_p5 = scmp.ne.s32.totalorder %s1221_s21, %s990_s9  ;;  %s995_s29 = scalar_lea.hbm %s1432_s1, 16384 }
  0x2f   : > { %p996_p10 = scmp.lt.u32.totalorder %s1221_s21, %s1432_s1  ;;  %p997_p12 = scmp.lt.u32.totalorder %s995_s29, %s990_s9 }
  0x30   : > { %p993_p6 = pnand %p991_p5, %p962_p11  ;;  %p999_p1 = scmp.lt.u32.totalorder %s990_s9, %s1221_s21 }
  0x31   : > { %p998_p0 = por %p997_p12, %p996_p10 }
  0x32   : > { %p994_p8 = pneg %p993_p6 }
  0x33   : > { %p1000_p2 = por %p999_p1, %p998_p0 }
  0x35   : > { %p1001_p13 = pnand %p1000_p2, %p994_p8 }
  0x37   : > { %1004 = shalt.err (!%p1001_p13)
}
  0x38   : > { %s1005_s30 = scalar_lea.vmem %s1225_s24, 8192  ;;  %s1079_s14 = smov [#allocation4]  }
  0x39   : > { %p1006_p3 = scmp.ne.s32.totalorder %s1225_s24, %s1005_s30  ;;  %s1010_s15 = sshll.u32 %s1079_s14, 4  ;;  %s1011_s15 = int_to_ptr.vmem [resolvable:$false] %s1010_s15 }
  0x3a   : > { %s1012_s23 = scalar_lea.vmem %s1011_s15, 16384  ;;  %p1013_p7 = scmp.lt.s32.totalorder %s1225_s24, %s1011_s15 }
  0x3b   : > { %p1008_p5 = pnand %p1006_p3, %p962_p11  ;;  %p1014_p10 = scmp.lt.s32.totalorder %s1012_s23, %s1005_s30 }
  0x3d   : > { %p1009_p6 = pneg %p1008_p5  ;;  %p1015_p12 = por %p1014_p10, %p1013_p7 }
  0x3f   : > { %p1016_p0 = pnand %p1015_p12, %p1009_p6 }
  0x41   : > { %1019 = shalt.err (!%p1016_p0)
}
  0x42   : > { %902 = dma.hbm_to_vmem [thread:$0]  (!%p1173_p9), %s1221_s21, 8192, %s1225_s24, %s206_s7, %s1077_s8, %s1077_s8, %s1078_s12  }
  0x43   : > { %230 = sbr.rel (%p1212_p4) target bundleno = 537 (0x219), region = 36  ;;  %s232_s9 = sand.u32 (!%p1212_p4), 1, %s1058_s16  }
  0x44   : > { %s758_s11 = sshll.u32 (!%p1212_p4), %s232_s9, 9  ;;  %s233_s25 = scalar_lea.sflag (!%p1212_p4), [#allocation3], %s232_s9 }
  0x45   : > { %s1259_s29 = scalar_lea.vmem (!%p1212_p4), [#allocation2], %s758_s11  ;;  %p1441_p7 = scmp.ne.s32.totalorder (!%p1212_p4), %s1438_s26, 0 }
  0x4a   : > { %1045 = dma.done.wait (%p1441_p7), %s233_s25, 8192  }
  0x4b   : > { %1047 = vsyncadd (%p1441_p7), %s233_s25, 4294959104  ;;  %s242_s28 = scalar_lea.sflag [#allocation5], %s232_s9  ;;  %s1265_s10 = scalar_lea.vmem [#allocation4], %s758_s11 }
  0x4c   : > { %1049 = dma.done.wait (%p1441_p7), %s242_s28, 8192  }
  0x4d   : > { %1051 = vsyncadd (%p1441_p7), %s242_s28, 4294959104  ;;  %v1080_v0 = vmov 0   ;;  %v288_v1 = vld [vmem:[%s1259_s29 + $0x8] sm:$0xff]  ;;  %v290_v2 = vld [vmem:[%s1259_s29 + $0x18] sm:$0xff]  ;;  %p278_p9 = scmp.lt.s32.totalorder %s1066_s18, 1  ;;  %vm639_vm0 = vcmask 0  }
  0x4e   : > { %955 = vset.pattern.permute.xlu0 %v1080_v0  ;;  %v428_v3 = vld [vmem:[%s1265_s10 + $0x8] sm:$0xff]  ;;  %v764_v4 = vpack.c.bf16 %v290_v2, %v288_v1  ;;  %v430_v5 = vld [vmem:[%s1265_s10 + $0x18] sm:$0xff]  ;;  %v287_v6 = vld [vmem:[%s1259_s29] sm:$0xff] }
  0x4f   : > { %v289_v7 = vld [vmem:[%s1259_s29 + $0x10] sm:$0xff]  ;;  %v828_v8 = vpack.c.bf16 %v430_v5, %v428_v3  ;;  %v427_v10 = vld [vmem:[%s1265_s10] sm:$0xff]  ;;  %v292_v12 = vld [vmem:[%s1259_s29 + $0x28] sm:$0xff]  ;;  %s1450_s18 = smov (!%p278_p9, %s1066_s18), 1 }
  0x50   : > { %v766_v9 = vpack.c.bf16 %v289_v7, %v287_v6  ;;  %v429_v11 = vld [vmem:[%s1265_s10 + $0x10] sm:$0xff]  ;;  %765 = vmatprep.subr.bf16.mxu0 %v764_v4  ;;  %v294_v14 = vld [vmem:[%s1259_s29 + $0x38] sm:$0xff]  ;;  %v432_v15 = vld [vmem:[%s1265_s10 + $0x28] sm:$0xff]  ;;  %s283_s6 = scalar_lea.vmem %s1435_s4, %s1450_s18 }
  0x51   : > { %v830_v13 = vpack.c.bf16 %v429_v11, %v427_v10  ;;  %v434_v16 = vld [vmem:[%s1265_s10 + $0x38] sm:$0xff]  ;;  %829 = vmatprep.subr.bf16.mxu1 %v828_v8  ;;  %v768_v17 = vpack.c.bf16 %v294_v14, %v292_v12  ;;  %v291_v19 = vld [vmem:[%s1259_s29 + $0x20] sm:$0xff]  ;;  %v293_v20 = vld [vmem:[%s1259_s29 + $0x30] sm:$0xff] }
  0x52   : > { %767 = vmatpush1.bf16.msra.mxu0 %v766_v9  ;;  %v832_v18 = vpack.c.bf16 %v434_v16, %v432_v15  ;;  %v431_v21 = vld [vmem:[%s1265_s10 + $0x20] sm:$0xff]  ;;  %v770_v22 = vpack.c.bf16 %v293_v20, %v291_v19  ;;  %v433_v23 = vld [vmem:[%s1265_s10 + $0x30] sm:$0xff]  ;;  %v296_v24 = vld [vmem:[%s1259_s29 + $0x48] sm:$0xff] }
  0x53   : > { %831 = vmatpush1.bf16.msra.mxu1 %v830_v13  ;;  %v298_v25 = vld [vmem:[%s1259_s29 + $0x58] sm:$0xff]  ;;  %769 = vmatprep.subr.bf16.mxu0 %v768_v17  ;;  %v834_v26 = vpack.c.bf16 %v433_v23, %v431_v21  ;;  %v436_v28 = vld [vmem:[%s1265_s10 + $0x48] sm:$0xff]  ;;  %v295_v30 = vld [vmem:[%s1259_s29 + $0x40] sm:$0xff] }
  0x54   : > { %833 = vmatprep.subr.bf16.mxu1 %v832_v18  ;;  %v772_v27 = vpack.c.bf16 %v298_v25, %v296_v24  ;;  %v438_v29 = vld [vmem:[%s1265_s10 + $0x58] sm:$0xff]  ;;  %v297_v32 = vld [vmem:[%s1259_s29 + $0x50] sm:$0xff]  ;;  %v435_v33 = vld [vmem:[%s1265_s10 + $0x40] sm:$0xff] }
  0x55   : > { %v836_v31 = vpack.c.bf16 %v438_v29, %v436_v28  ;;  %v437_v34 = vld [vmem:[%s1265_s10 + $0x50] sm:$0xff]  ;;  %v774_v35 = vpack.c.bf16 %v297_v32, %v295_v30  ;;  %v300_v36 = vld [vmem:[%s1259_s29 + $0x68] sm:$0xff]  ;;  %v302_v37 = vld [vmem:[%s1259_s29 + $0x78] sm:$0xff] }
  0x56   : > { %771 = vmatpush1.bf16.msra.mxu0 %v770_v22  ;;  %v440_v38 = vld [vmem:[%s1265_s10 + $0x68] sm:$0xff]  ;;  %v838_v39 = vpack.c.bf16 %v437_v34, %v435_v33  ;;  %v776_v40 = vpack.c.bf16 %v302_v37, %v300_v36  ;;  %v442_v41 = vld [vmem:[%s1265_s10 + $0x78] sm:$0xff]  ;;  %v299_v42 = vld [vmem:[%s1259_s29 + $0x60] sm:$0xff] }
  0x57   : > { %835 = vmatpush1.bf16.msra.mxu1 %v834_v26  ;;  %773 = vmatprep.subr.bf16.mxu0 %v772_v27  ;;  %v301_v43 = vld [vmem:[%s1259_s29 + $0x70] sm:$0xff]  ;;  %v840_v44 = vpack.c.bf16 %v442_v41, %v440_v38  ;;  %v439_v45 = vld [vmem:[%s1265_s10 + $0x60] sm:$0xff]  ;;  %v304_v47 = vld [vmem:[%s1259_s29 + $0x88] sm:$0xff] }
  0x58   : > { %837 = vmatprep.subr.bf16.mxu1 %v836_v31  ;;  %v441_v46 = vld [vmem:[%s1265_s10 + $0x70] sm:$0xff]  ;;  %v306_v48 = vld [vmem:[%s1259_s29 + $0x98] sm:$0xff]  ;;  %v444_v49 = vld [vmem:[%s1265_s10 + $0x88] sm:$0xff]  ;;  %v778_v51 = vpack.c.bf16 %v301_v43, %v299_v42 }
  0x59   : > { %v446_v50 = vld [vmem:[%s1265_s10 + $0x98] sm:$0xff]  ;;  %v842_v52 = vpack.c.bf16 %v441_v46, %v439_v45  ;;  %v780_v53 = vpack.c.bf16 %v306_v48, %v304_v47  ;;  %v303_v54 = vld [vmem:[%s1259_s29 + $0x80] sm:$0xff]  ;;  %v305_v55 = vld [vmem:[%s1259_s29 + $0x90] sm:$0xff] }
  0x5a   : > { %775 = vmatpush1.bf16.msra.mxu0 %v774_v35  ;;  %v443_v56 = vld [vmem:[%s1265_s10 + $0x80] sm:$0xff]  ;;  %v844_v57 = vpack.c.bf16 %v446_v50, %v444_v49  ;;  %v445_v58 = vld [vmem:[%s1265_s10 + $0x90] sm:$0xff]  ;;  %v308_v59 = vld [vmem:[%s1259_s29 + $0xa8] sm:$0xff]  ;;  %v782_v63 = vpack.c.bf16 %v305_v55, %v303_v54 }
  0x5b   : > { %839 = vmatpush1.bf16.msra.mxu1 %v838_v39  ;;  %777 = vmatprep.subr.bf16.mxu0 %v776_v40  ;;  %v310_v60 = vld [vmem:[%s1259_s29 + $0xb8] sm:$0xff]  ;;  %v448_v61 = vld [vmem:[%s1265_s10 + $0xa8] sm:$0xff]  ;;  %v846_v0 = vpack.c.bf16 %v445_v58, %v443_v56  ;;  %v307_v2 = vld [vmem:[%s1259_s29 + $0xa0] sm:$0xff] }
  0x5c   : > { %841 = vmatprep.subr.bf16.mxu1 %v840_v44  ;;  %v450_v62 = vld [vmem:[%s1265_s10 + $0xb8] sm:$0xff]  ;;  %v784_v1 = vpack.c.bf16 %v310_v60, %v308_v59  ;;  %v309_v3 = vld [vmem:[%s1259_s29 + $0xb0] sm:$0xff]  ;;  %v447_v4 = vld [vmem:[%s1265_s10 + $0xa0] sm:$0xff] }
  0x5d   : > { %v848_v5 = vpack.c.bf16 %v450_v62, %v448_v61  ;;  %v449_v6 = vld [vmem:[%s1265_s10 + $0xb0] sm:$0xff]  ;;  %v312_v7 = vld [vmem:[%s1259_s29 + $0xc8] sm:$0xff]  ;;  %v314_v8 = vld [vmem:[%s1259_s29 + $0xd8] sm:$0xff]  ;;  %v786_v11 = vpack.c.bf16 %v309_v3, %v307_v2 }
  0x5e   : > { %779 = vmatpush1.bf16.msra.mxu0 %v778_v51  ;;  %v452_v9 = vld [vmem:[%s1265_s10 + $0xc8] sm:$0xff]  ;;  %v454_v10 = vld [vmem:[%s1265_s10 + $0xd8] sm:$0xff]  ;;  %v850_v12 = vpack.c.bf16 %v449_v6, %v447_v4  ;;  %v788_v13 = vpack.c.bf16 %v314_v8, %v312_v7  ;;  %v311_v14 = vld [vmem:[%s1259_s29 + $0xc0] sm:$0xff] }
  0x5f   : > { %843 = vmatpush1.bf16.msra.mxu1 %v842_v52  ;;  %781 = vmatprep.subr.bf16.mxu0 %v780_v53  ;;  %v313_v15 = vld [vmem:[%s1259_s29 + $0xd0] sm:$0xff]  ;;  %v451_v16 = vld [vmem:[%s1265_s10 + $0xc0] sm:$0xff]  ;;  %v852_v17 = vpack.c.bf16 %v454_v10, %v452_v9  ;;  %v316_v19 = vld [vmem:[%s1259_s29 + $0xe8] sm:$0xff] }
  0x60   : > { %845 = vmatprep.subr.bf16.mxu1 %v844_v57  ;;  %v453_v18 = vld [vmem:[%s1265_s10 + $0xd0] sm:$0xff]  ;;  %v318_v20 = vld [vmem:[%s1259_s29 + $0xf8] sm:$0xff]  ;;  %v456_v21 = vld [vmem:[%s1265_s10 + $0xe8] sm:$0xff]  ;;  %v790_v23 = vpack.c.bf16 %v313_v15, %v311_v14 }
  0x61   : > { %v458_v22 = vld [vmem:[%s1265_s10 + $0xf8] sm:$0xff]  ;;  %v854_v24 = vpack.c.bf16 %v453_v18, %v451_v16  ;;  %v792_v25 = vpack.c.bf16 %v318_v20, %v316_v19  ;;  %v315_v26 = vld [vmem:[%s1259_s29 + $0xe0] sm:$0xff]  ;;  %v317_v27 = vld [vmem:[%s1259_s29 + $0xf0] sm:$0xff] }
  0x62   : > { %783 = vmatpush1.bf16.msra.mxu0 %v782_v63  ;;  %v455_v28 = vld [vmem:[%s1265_s10 + $0xe0] sm:$0xff]  ;;  %v856_v29 = vpack.c.bf16 %v458_v22, %v456_v21  ;;  %v457_v30 = vld [vmem:[%s1265_s10 + $0xf0] sm:$0xff]  ;;  %v320_v31 = vld [vmem:[%s1259_s29 + $0x108] sm:$0xff]  ;;  %v794_v35 = vpack.c.bf16 %v317_v27, %v315_v26 }
  0x63   : > { %847 = vmatpush1.bf16.msra.mxu1 %v846_v0  ;;  %785 = vmatprep.subr.bf16.mxu0 %v784_v1  ;;  %v322_v32 = vld [vmem:[%s1259_s29 + $0x118] sm:$0xff]  ;;  %v460_v33 = vld [vmem:[%s1265_s10 + $0x108] sm:$0xff]  ;;  %v858_v36 = vpack.c.bf16 %v457_v30, %v455_v28  ;;  %v319_v38 = vld [vmem:[%s1259_s29 + $0x100] sm:$0xff] }
  0x64   : > { %849 = vmatprep.subr.bf16.mxu1 %v848_v5  ;;  %v462_v34 = vld [vmem:[%s1265_s10 + $0x118] sm:$0xff]  ;;  %v796_v37 = vpack.c.bf16 %v322_v32, %v320_v31  ;;  %v321_v39 = vld [vmem:[%s1259_s29 + $0x110] sm:$0xff]  ;;  %v459_v40 = vld [vmem:[%s1265_s10 + $0x100] sm:$0xff] }
  0x65   : > { %v860_v41 = vpack.c.bf16 %v462_v34, %v460_v33  ;;  %v461_v42 = vld [vmem:[%s1265_s10 + $0x110] sm:$0xff]  ;;  %v324_v43 = vld [vmem:[%s1259_s29 + $0x128] sm:$0xff]  ;;  %v326_v44 = vld [vmem:[%s1259_s29 + $0x138] sm:$0xff]  ;;  %v798_v47 = vpack.c.bf16 %v321_v39, %v319_v38 }
  0x66   : > { %787 = vmatpush1.bf16.msra.mxu0 %v786_v11  ;;  %v464_v45 = vld [vmem:[%s1265_s10 + $0x128] sm:$0xff]  ;;  %v466_v46 = vld [vmem:[%s1265_s10 + $0x138] sm:$0xff]  ;;  %v862_v48 = vpack.c.bf16 %v461_v42, %v459_v40  ;;  %v800_v49 = vpack.c.bf16 %v326_v44, %v324_v43  ;;  %v323_v50 = vld [vmem:[%s1259_s29 + $0x120] sm:$0xff] }
  0x67   : > { %851 = vmatpush1.bf16.msra.mxu1 %v850_v12  ;;  %789 = vmatprep.subr.bf16.mxu0 %v788_v13  ;;  %v325_v51 = vld [vmem:[%s1259_s29 + $0x130] sm:$0xff]  ;;  %v463_v52 = vld [vmem:[%s1265_s10 + $0x120] sm:$0xff]  ;;  %v864_v53 = vpack.c.bf16 %v466_v46, %v464_v45  ;;  %v328_v55 = vld [vmem:[%s1259_s29 + $0x148] sm:$0xff] }
  0x68   : > { %853 = vmatprep.subr.bf16.mxu1 %v852_v17  ;;  %v465_v54 = vld [vmem:[%s1265_s10 + $0x130] sm:$0xff]  ;;  %v330_v56 = vld [vmem:[%s1259_s29 + $0x158] sm:$0xff]  ;;  %v468_v57 = vld [vmem:[%s1265_s10 + $0x148] sm:$0xff]  ;;  %v802_v59 = vpack.c.bf16 %v325_v51, %v323_v50 }
  0x69   : > { %v470_v58 = vld [vmem:[%s1265_s10 + $0x158] sm:$0xff]  ;;  %v866_v60 = vpack.c.bf16 %v465_v54, %v463_v52  ;;  %v804_v61 = vpack.c.bf16 %v330_v56, %v328_v55  ;;  %v327_v62 = vld [vmem:[%s1259_s29 + $0x140] sm:$0xff]  ;;  %v329_v63 = vld [vmem:[%s1259_s29 + $0x150] sm:$0xff] }
  0x6a   : > { %791 = vmatpush1.bf16.msra.mxu0 %v790_v23  ;;  %v467_v0 = vld [vmem:[%s1265_s10 + $0x140] sm:$0xff]  ;;  %v868_v1 = vpack.c.bf16 %v470_v58, %v468_v57  ;;  %v469_v2 = vld [vmem:[%s1265_s10 + $0x150] sm:$0xff]  ;;  %v332_v3 = vld [vmem:[%s1259_s29 + $0x168] sm:$0xff]  ;;  %v806_v7 = vpack.c.bf16 %v329_v63, %v327_v62 }
  0x6b   : > { %855 = vmatpush1.bf16.msra.mxu1 %v854_v24  ;;  %793 = vmatprep.subr.bf16.mxu0 %v792_v25  ;;  %v334_v4 = vld [vmem:[%s1259_s29 + $0x178] sm:$0xff]  ;;  %v472_v5 = vld [vmem:[%s1265_s10 + $0x168] sm:$0xff]  ;;  %v331_v8 = vld [vmem:[%s1259_s29 + $0x160] sm:$0xff]  ;;  %v870_v9 = vpack.c.bf16 %v469_v2, %v467_v0 }
  0x6c   : > { %857 = vmatprep.subr.bf16.mxu1 %v856_v29  ;;  %v474_v6 = vld [vmem:[%s1265_s10 + $0x178] sm:$0xff]  ;;  %v808_v10 = vpack.c.bf16 %v334_v4, %v332_v3  ;;  %v333_v11 = vld [vmem:[%s1259_s29 + $0x170] sm:$0xff]  ;;  %v471_v12 = vld [vmem:[%s1265_s10 + $0x160] sm:$0xff] }
  0x6d   : > { %v473_v13 = vld [vmem:[%s1265_s10 + $0x170] sm:$0xff]  ;;  %v872_v14 = vpack.c.bf16 %v474_v6, %v472_v5  ;;  %v336_v15 = vld [vmem:[%s1259_s29 + $0x188] sm:$0xff]  ;;  %v338_v16 = vld [vmem:[%s1259_s29 + $0x198] sm:$0xff]  ;;  %v810_v21 = vpack.c.bf16 %v333_v11, %v331_v8 }
  0x6e   : > { %795 = vmatpush1.bf16.msra.mxu0 %v794_v35  ;;  %v285_v17 = vld [vmem:[%s1433_s2 + $0x8] sm:$0xff]  ;;  %v478_v19 = vld [vmem:[%s1265_s10 + $0x198] sm:$0xff]  ;;  %v286_v20 = vld [vmem:[%s1434_s3] sm:$0xff]  ;;  %v874_v22 = vpack.c.bf16 %v473_v13, %v471_v12  ;;  %v812_v23 = vpack.c.bf16 %v338_v16, %v336_v15 }
  0x6f   : > { %859 = vmatpush1.bf16.msra.mxu1 %v858_v36  ;;  %797 = vmatprep.subr.bf16.mxu0 %v796_v37  ;;  %v476_v18 = vld [vmem:[%s1265_s10 + $0x188] sm:$0xff]  ;;  %v335_v24 = vld [vmem:[%s1259_s29 + $0x180] sm:$0xff]  ;;  %v337_v25 = vld [vmem:[%s1259_s29 + $0x190] sm:$0xff] }
  0x70   : > { %861 = vmatprep.subr.bf16.mxu1 %v860_v41  ;;  %420 = vmatprep.mubr.f32.mxu0 %v285_v17  ;;  %v475_v26 = vld [vmem:[%s1265_s10 + $0x180] sm:$0xff]  ;;  %v876_v27 = vpack.c.bf16 %v478_v19, %v476_v18  ;;  %v477_v28 = vld [vmem:[%s1265_s10 + $0x190] sm:$0xff]  ;;  %v340_v29 = vld [vmem:[%s1259_s29 + $0x1a8] sm:$0xff]  ;;  %v814_v33 = vpack.c.bf16 %v337_v25, %v335_v24 }
  0x71   : > { %555 = vmatprep.mubr.f32.mxu1 %v285_v17  ;;  %353 = vperm.xlu0 %955, %v286_v20   ;;  %v342_v30 = vld [vmem:[%s1259_s29 + $0x1b8] sm:$0xff]  ;;  %v480_v31 = vld [vmem:[%s1265_s10 + $0x1a8] sm:$0xff]  ;;  %v878_v34 = vpack.c.bf16 %v477_v28, %v475_v26  ;;  %v339_v36 = vld [vmem:[%s1259_s29 + $0x1a0] sm:$0xff] }
  0x72   : > { %799 = vmatpush1.bf16.msra.mxu0 %v798_v47  ;;  %v482_v32 = vld [vmem:[%s1265_s10 + $0x1b8] sm:$0xff]  ;;  %v816_v35 = vpack.c.bf16 %v342_v30, %v340_v29  ;;  %v341_v37 = vld [vmem:[%s1259_s29 + $0x1b0] sm:$0xff]  ;;  %v479_v38 = vld [vmem:[%s1265_s10 + $0x1a0] sm:$0xff] }
  0x73   : > { %863 = vmatpush1.bf16.msra.mxu1 %v862_v48  ;;  %801 = vmatprep.subr.bf16.mxu0 %v800_v49  ;;  %v880_v39 = vpack.c.bf16 %v482_v32, %v480_v31  ;;  %v481_v40 = vld [vmem:[%s1265_s10 + $0x1b0] sm:$0xff]  ;;  %v344_v41 = vld [vmem:[%s1259_s29 + $0x1c8] sm:$0xff]  ;;  %v346_v42 = vld [vmem:[%s1259_s29 + $0x1d8] sm:$0xff]  ;;  %v818_v45 = vpack.c.bf16 %v341_v37, %v339_v36 }
  0x74   : > { %865 = vmatprep.subr.bf16.mxu1 %v864_v53  ;;  %v484_v43 = vld [vmem:[%s1265_s10 + $0x1c8] sm:$0xff]  ;;  %v486_v44 = vld [vmem:[%s1265_s10 + $0x1d8] sm:$0xff]  ;;  %v882_v46 = vpack.c.bf16 %v481_v40, %v479_v38  ;;  %v820_v47 = vpack.c.bf16 %v346_v42, %v344_v41  ;;  %v343_v48 = vld [vmem:[%s1259_s29 + $0x1c0] sm:$0xff] }
  0x75   : > { %v345_v49 = vld [vmem:[%s1259_s29 + $0x1d0] sm:$0xff]  ;;  %v483_v50 = vld [vmem:[%s1265_s10 + $0x1c0] sm:$0xff]  ;;  %v884_v51 = vpack.c.bf16 %v486_v44, %v484_v43  ;;  %v348_v53 = vld [vmem:[%s1259_s29 + $0x1e8] sm:$0xff] }
  0x76   : > { %803 = vmatpush1.bf16.msra.mxu0 %v802_v59  ;;  %v485_v52 = vld [vmem:[%s1265_s10 + $0x1d0] sm:$0xff]  ;;  %v350_v54 = vld [vmem:[%s1259_s29 + $0x1f8] sm:$0xff]  ;;  %v488_v55 = vld [vmem:[%s1265_s10 + $0x1e8] sm:$0xff]  ;;  %v822_v57 = vpack.c.bf16 %v345_v49, %v343_v48 }
  0x77   : > { %867 = vmatpush1.bf16.msra.mxu1 %v866_v60  ;;  %805 = vmatprep.subr.bf16.mxu0 %v804_v61  ;;  %v490_v56 = vld [vmem:[%s1265_s10 + $0x1f8] sm:$0xff]  ;;  %v886_v58 = vpack.c.bf16 %v485_v52, %v483_v50  ;;  %v824_v59 = vpack.c.bf16 %v350_v54, %v348_v53  ;;  %v347_v60 = vld [vmem:[%s1259_s29 + $0x1e0] sm:$0xff]  ;;  %v349_v61 = vld [vmem:[%s1259_s29 + $0x1f0] sm:$0xff] }
  0x78   : > { %869 = vmatprep.subr.bf16.mxu1 %v868_v1  ;;  %v888_v62 = vpack.c.bf16 %v490_v56, %v488_v55  ;;  %v487_v63 = vld [vmem:[%s1265_s10 + $0x1e0] sm:$0xff]  ;;  %v489_v0 = vld [vmem:[%s1265_s10 + $0x1f0] sm:$0xff]  ;;  %v826_v1 = vpack.c.bf16 %v349_v61, %v347_v60 }
  0x79   : > { %v890_v2 = vpack.c.bf16 %v489_v0, %v487_v63  ;;  %v284_v3 = vld [vmem:[%s1433_s2] sm:$0xff] }
  0x7a   : > { %807 = vmatpush1.bf16.msra.mxu0 %v806_v7 }
  0x7b   : > { %871 = vmatpush1.bf16.msra.mxu1 %v870_v9  ;;  %809 = vmatprep.subr.bf16.mxu0 %v808_v10 }
  0x7c   : > { %873 = vmatprep.subr.bf16.mxu1 %v872_v14 }
  0x7e   : > { %811 = vmatpush1.bf16.msra.mxu0 %v810_v21 }
  0x7f   : > { %875 = vmatpush1.bf16.msra.mxu1 %v874_v22  ;;  %813 = vmatprep.subr.bf16.mxu0 %v812_v23 }
  0x80   : > { %877 = vmatprep.subr.bf16.mxu1 %v876_v27 }
  0x82   : > { %815 = vmatpush1.bf16.msra.mxu0 %v814_v33 }
  0x83   : > { %879 = vmatpush1.bf16.msra.mxu1 %v878_v34  ;;  %817 = vmatprep.subr.bf16.mxu0 %v816_v35 }
  0x84   : > { %881 = vmatprep.subr.bf16.mxu1 %v880_v39 }
  0x86   : > { %819 = vmatpush1.bf16.msra.mxu0 %v818_v45 }
  0x87   : > { %883 = vmatpush1.bf16.msra.mxu1 %v882_v46  ;;  %821 = vmatprep.subr.bf16.mxu0 %v820_v47 }
  0x88   : > { %885 = vmatprep.subr.bf16.mxu1 %v884_v51 }
  0x8a   : > { %823 = vmatpush1.bf16.msra.mxu0 %v822_v57 }
  0x8b   : > { %887 = vmatpush1.bf16.msra.mxu1 %v886_v58  ;;  %825 = vmatprep.subr.bf16.mxu0 %v824_v59 }
  0x8c   : > { %889 = vmatprep.subr.bf16.mxu1 %v888_v62 }
  0x8e   : > { %827 = vmatpush1.bf16.msra.mxu0 %v826_v1 }
  0x8f   : > { %891 = vmatpush1.bf16.msra.mxu1 %v890_v2 }
  0x91   : > { %421 = vmatmul.mubr.f32.vlgmr.msra.gmra.mrb[0].mxu0 %v284_v3 }
  0x92   : > { %556 = vmatmul.mubr.f32.vlgmr.msra.gmra.mrb[0].mxu1 %v284_v3 }
  0xf0   : > { %v354_v4 = vpop.permute.xlu0 %353 }
 0x164   : > { %v422_v5 = vpop.f32.mrb[0].mxu0 }
 0x165   : > { %v423_v6 = vadd.f32 %v422_v5, %v354_v4  ;;  %v557_v7 = vpop.f32.mrb[0].mxu1  ;;  %v424_v8 = vpop.f32.mrb[1].mxu0 }
 0x166   : > { %v558_v9 = vadd.f32 %v557_v7, %v354_v4  ;;  %v425_v10 = vadd.f32 %v424_v8, %v354_v4  ;;  %v559_v11 = vpop.f32.mrb[1].mxu1 }
 0x167   : > { %v576_v12 = vmul.f32 %v423_v6, %v423_v6  ;;  %v560_v13 = vadd.f32 %v559_v11, %v354_v4 }
 0x168   : > { %v562_v14 = vmul.f32 %v558_v9, %v423_v6  ;;  %v590_v15 = vmul.f32 %v558_v9, %v558_v9  ;;  %v577_v16 = vmul.f32 %v425_v10, %v425_v10 }
 0x169   : > { %v578_v17 = vrot.slane %v576_v12, 4  ;;  %v563_v18 = vmul.f32 %v560_v13, %v425_v10  ;;  %v591_v19 = vmul.f32 %v560_v13, %v560_v13 }
 0x16a   : > { %v592_v20 = vrot.slane %v590_v15, 4  ;;  %v584_v21 = vrot.slane %v577_v16, 4  ;;  %v564_v31 = vrot.slane %v562_v14, 4 }
 0x16b   : > { %v579_v22 = vadd.f32 %v578_v17, %v576_v12  ;;  %v598_v23 = vrot.slane %v591_v19, 4  ;;  %v570_v35 = vrot.slane %v563_v18, 4 }
 0x16c   : > { %v593_v24 = vadd.f32 %v592_v20, %v590_v15  ;;  %v585_v25 = vadd.f32 %v584_v21, %v577_v16  ;;  %v565_v41 = vadd.f32 %v564_v31, %v562_v14 }
 0x16d   : > { %v580_v26 = vrot.slane %v579_v22, 2  ;;  %v599_v27 = vadd.f32 %v598_v23, %v591_v19  ;;  %v571_v45 = vadd.f32 %v570_v35, %v563_v18 }
 0x16e   : > { %v594_v28 = vrot.slane %v593_v24, 2  ;;  %v586_v29 = vrot.slane %v585_v25, 2  ;;  %v566_v48 = vrot.slane %v565_v41, 2 }
 0x16f   : > { %v581_v30 = vadd.f32 %v580_v26, %v579_v22  ;;  %v600_v32 = vrot.slane %v599_v27, 2  ;;  %v572_v51 = vrot.slane %v571_v45, 2 }
 0x170   : > { %v595_v33 = vadd.f32 %v594_v28, %v593_v24  ;;  %v587_v34 = vadd.f32 %v586_v29, %v585_v25  ;;  %v567_v53 = vadd.f32 %v566_v48, %v565_v41 }
 0x171   : > { %v582_v36 = vrot.slane %v581_v30, 1  ;;  %v601_v37 = vadd.f32 %v600_v32, %v599_v27  ;;  %v573_v54 = vadd.f32 %v572_v51, %v571_v45 }
 0x172   : > { %v596_v38 = vrot.slane %v595_v33, 1  ;;  %v588_v39 = vrot.slane %v587_v34, 1  ;;  %v568_v55 = vrot.slane %v567_v53, 1 }
 0x173   : > { %v583_v40 = vadd.f32 %v582_v36, %v581_v30  ;;  %v602_v42 = vrot.slane %v601_v37, 1  ;;  %v574_v56 = vrot.slane %v573_v54, 1 }
 0x174   : > { %v597_v43 = vadd.f32 %v596_v38, %v595_v33  ;;  %v589_v44 = vadd.f32 %v588_v39, %v587_v34  ;;  %v569_v57 = vadd.f32 %v568_v55, %v567_v53 }
 0x175   : > { %v603_v46 = vadd.f32 %v602_v42, %v601_v37  ;;  %v575_v59 = vadd.f32 %v574_v56, %v573_v54 }
 0x176   : > { %v604_v47 = vmul.f32 %v597_v43, %v583_v40 }
 0x177   : > { %v605_v49 = vmul.f32 %v603_v46, %v589_v44 }
 0x178   : > { %v606_v50 = vmax.f32 %v604_v47, 1e-16 }
 0x179   : > { %v607_v52 = vmax.f32 %v605_v49, 1e-16 }
 0x17a   : > { %956 = vrsqrt.f32 %v606_v50 }
 0x17b   : > { %958 = vrsqrt.f32 %v607_v52 }
 0x184   : > { %v957_v58 = vpop.eup %956 }
 0x185   : > { %v959_v60 = vpop.eup %958  ;;  %v610_v61 = vmul.f32 %v957_v58, %v569_v57 }
 0x186   : > { %v611_v62 = vmul.f32 %v959_v60, %v575_v59 }
 0x188   : > { %v636_v63 = vadd.f32 %v611_v62, %v610_v61 }
 0x18a   : > { %637 = vadd.xlane.f32.xlu0 %v636_v63 }
 0x217   : > { %v638_v0 = vpop.xlane.xlu0 %637 }
 0x218   : > { %640 = vst.msk [vmem:[%s283_s6] sm:$0x1] %vm639_vm0, %v638_v0 }
 0x219 PF: > { %s20_s20 = sadd.s32 1, %s1074_s20   ;;  %s1442_s15 = smov %s1058_s16 }
 0x21a   : > { %p17_p11 = scmp.ge.s32.totalorder %s20_s20, 4   ;;  %s1443_s16 = smov %s1062_s17 }
 0x21b   : > { %s1444_s17 = smov %s1155_s27  ;;  %s1445_s18 = smov %s1070_s19 }
 0x21c   : > { %s1446_s19 = smov %s1448_s22  ;;  %19 = sbr.rel (!%p17_p11) target bundleno = 6 (0x6), region = 97 }
 0x223   :  { %664 = vsyncpa [#allocation3], 1 }
 0x224   :  { %666 = vsyncpa [#allocation3 + $0x1], 1 }
 0x225   :  { %667 = vsyncpa [#allocation5], 1 }
 0x226   :  { %669 = vsyncpa [#allocation5 + $0x1], 1 }

</bundles_post_ra>
